<compile_context>
chip_gen: v5e
topology: v5e:2x2
jax: 0.10.0
libtpu: 0.0.40
codegen_flags: <defaults>
</compile_context>

<pallas_src>
import functools

import jax
import jax.numpy as jnp
from jax.experimental import pallas as pl
from jax.experimental.pallas import tpu as pltpu


def _round_up(x, m):
    return ((x + m - 1) // m) * m


# -----------------------------------------------------------------------------
# Fused LSTM + decoder kernel.
# Grid: (num_time_chunks,). h/c live in the resident hn/cn output blocks.
# PyTorch gate order: i, f, g, o.
# -----------------------------------------------------------------------------
def _soccer_rnn_kernel(x_ref, h0_ref, c0_ref, w_ih_ref, w_hh_ref, b_ref,
                       w_dec_ref, b_dec_ref,
                       out_ref, hn_ref, cn_ref,
                       xproj_ref,
                       *, hidden_size, gate_stride, chunk, unroll):
    n = pl.program_id(0)
    H = hidden_size
    Hp = gate_stride
    B = hn_ref.shape[0]
    I = x_ref.shape[-1]

    # First grid step: seed resident accumulators + zero the output block.
    @pl.when(n == 0)
    def _():
        hn_ref[...] = h0_ref[...]
        cn_ref[...] = c0_ref[...]
        out_ref[...] = jnp.zeros_like(out_ref)

    # ---- Hoisted input projection: one MXU op for the whole chunk, bias fused.
    # x_proj[t*B:(t+1)*B, :] = x_t @ W_ih^T + (b_ih + b_hh)
    x_flat = x_ref[...].reshape(chunk * B, I)                     # bf16
    xproj_ref[...] = (
        jnp.dot(x_flat, w_ih_ref[...], preferred_element_type=jnp.float32)
        + b_ref[...])                                             # f32

    w_hh = w_hh_ref[...]          # f32 (H, 4*Hp), hoisted out of the loop

    def step(t, carry):
        h, c = carry                                              # f32 (B, H)
        # Only one (B,H)x(H,4Hp) matmul remains on the serial chain.
        gates = (xproj_ref[pl.ds(t * B, B), :]
                 + jnp.dot(h, w_hh, preferred_element_type=jnp.float32))
        i_g = jax.nn.sigmoid(gates[:, 0 * Hp:0 * Hp + H])
        f_g = jax.nn.sigmoid(gates[:, 1 * Hp:1 * Hp + H])
        g_g = jnp.tanh(gates[:, 2 * Hp:2 * Hp + H])
        o_g = jax.nn.sigmoid(gates[:, 3 * Hp:3 * Hp + H])
        c_new = f_g * c + i_g * g_g
        h_new = o_g * jnp.tanh(c_new)
        return h_new, c_new

    h, c = jax.lax.fori_loop(0, chunk, step, (hn_ref[...], cn_ref[...]),
                             unroll=unroll)
    hn_ref[...] = h
    cn_ref[...] = c

    # Fused decoder on the final grid step: out = h_T @ W_dec^T + b_dec.
    @pl.when(n == pl.num_programs(0) - 1)
    def _():
        out_ref[...] = (
            jnp.dot(h, w_dec_ref[...], preferred_element_type=jnp.float32)
            + b_dec_ref[...])


def _pick_time_chunk(T, max_chunk=64):
    if T <= max_chunk:
        return T
    for c in range(max_chunk, 0, -1):
        if T % c == 0:
            return c
    return 1


def soccer_rnn_pallas(x_tmajor, h0, c0, kp):
    """x_tmajor: (T, B, I) f32; h0/c0: (B, H) f32; kp: prepared kernel params."""
    T, B, I = x_tmajor.shape
    H = h0.shape[-1]
    Hp = kp["gate_stride"]
    chunk = _pick_time_chunk(T)
    unroll = True if chunk <= 16 else 16
    num_chunks = T // chunk

    # bf16 input: halves the only HBM->VMEM stream that scales with T.
    x_bf16 = x_tmajor.astype(jnp.bfloat16)

    grid_spec = pltpu.PrefetchScalarGridSpec(
        num_scalar_prefetch=0,
        grid=(num_chunks,),
        in_specs=[
            pl.BlockSpec((chunk, B, I), lambda n: (n, 0, 0)),   # x chunk (bf16)
            pl.BlockSpec((B, H), lambda n: (0, 0)),             # h0
            pl.BlockSpec((B, H), lambda n: (0, 0)),             # c0
            pl.BlockSpec((I, 4 * Hp), lambda n: (0, 0)),        # W_ih^T   bf16
            pl.BlockSpec((H, 4 * Hp), lambda n: (0, 0)),        # W_hh^T   f32
            pl.BlockSpec((1, 4 * Hp), lambda n: (0, 0)),        # fused LSTM bias
            pl.BlockSpec((H, I), lambda n: (0, 0)),             # W_dec^T  f32
            pl.BlockSpec((1, I), lambda n: (0, 0)),             # b_dec
        ],
        out_specs=[
            pl.BlockSpec((B, I), lambda n: (0, 0)),             # decoded output
            pl.BlockSpec((B, H), lambda n: (0, 0)),             # h_n (resident)
            pl.BlockSpec((B, H), lambda n: (0, 0)),             # c_n (resident)
        ],
        scratch_shapes=[pltpu.VMEM((chunk * B, 4 * Hp), jnp.float32)],
    )

    cost = pl.CostEstimate(
        flops=2 * T * B * (I + H) * 4 * Hp + 2 * B * H * I,
        transcendentals=5 * T * B * H,
        bytes_accessed=(T * B * I * 2                 # x (bf16)
                        + I * 4 * Hp * 2              # W_ih (bf16)
                        + (H + 1) * 4 * Hp * 4        # W_hh + bias (f32)
                        + (H + 1) * I * 4             # decoder weights
                        + 4 * B * H * 4 + B * I * 4), # h0/c0/hn/cn + out
    )

    return pl.pallas_call(
        functools.partial(_soccer_rnn_kernel,
                          hidden_size=H, gate_stride=Hp,
                          chunk=chunk, unroll=unroll),
        grid_spec=grid_spec,
        out_shape=(
            jax.ShapeDtypeStruct((B, I), jnp.float32),
            jax.ShapeDtypeStruct((B, H), jnp.float32),
            jax.ShapeDtypeStruct((B, H), jnp.float32),
        ),
        compiler_params=pltpu.CompilerParams(
            dimension_semantics=("arbitrary",),       # time is sequential
            vmem_limit_bytes=32 * 1024 * 1024),       # safe on v7x (64 MiB phys)
        cost_estimate=cost,
    )(x_bf16, h0, c0,
      kp["w_ih_t"], kp["w_hh_t"], kp["b_lstm"], kp["w_dec_t"], kp["b_dec"])


# -----------------------------------------------------------------------------
# Parameter init (PyTorch shapes) and kernel-layout preparation.
# -----------------------------------------------------------------------------
def init_raw_params(key, input_size, hidden_size):
    ks = jax.random.split(key, 6)
    bound = 1.0 / jnp.sqrt(hidden_size)
    return {
        "w_ih": jax.random.uniform(ks[0], (4 * hidden_size, input_size),
                                   jnp.float32, -bound, bound),
        "w_hh": jax.random.uniform(ks[1], (4 * hidden_size, hidden_size),
                                   jnp.float32, -bound, bound),
        "b_ih": jax.random.uniform(ks[2], (4 * hidden_size,),
                                   jnp.float32, -bound, bound),
        "b_hh": jax.random.uniform(ks[3], (4 * hidden_size,),
                                   jnp.float32, -bound, bound),
        "w_dec": jax.random.uniform(ks[4], (input_size, hidden_size),
                                    jnp.float32, -bound, bound),
        "b_dec": jax.random.uniform(ks[5], (input_size,),
                                    jnp.float32, -bound, bound),
    }


def prepare_kernel_params(raw, input_size, hidden_size):
    I, H = input_size, hidden_size
    # Lane-align gate bands only when H is large enough that padding pays off;
    # for small H (e.g. 32 -> 4H = 128) padding would 4x the MXU result width.
    Hp = H if (H % 128 == 0 or H < 128) else _round_up(H, 128)

    w_ih_t = raw["w_ih"].T                     # (I, 4H)
    w_hh_t = raw["w_hh"].T                     # (H, 4H)
    b_fused = raw["b_ih"] + raw["b_hh"]        # (4H,)
    if Hp != H:
        w_ih_t = jnp.pad(w_ih_t.reshape(I, 4, H),
                         ((0, 0), (0, 0), (0, Hp - H))).reshape(I, 4 * Hp)
        w_hh_t = jnp.pad(w_hh_t.reshape(H, 4, H),
                         ((0, 0), (0, 0), (0, Hp - H))).reshape(H, 4 * Hp)
        b_fused = jnp.pad(b_fused.reshape(4, H),
                          ((0, 0), (0, Hp - H))).reshape(4 * Hp)

    return {
        "gate_stride": Hp,
        "w_ih_t": w_ih_t.astype(jnp.bfloat16),    # bf16: feed-forward x path only
        "w_hh_t": w_hh_t.astype(jnp.float32),     # f32: keep the recurrence exact
        "b_lstm": b_fused[None, :].astype(jnp.float32),     # (1, 4*Hp)
        "w_dec_t": raw["w_dec"].T.astype(jnp.float32),      # (H, I)
        "b_dec": raw["b_dec"][None, :].astype(jnp.float32), # (1, I)
    }


# -----------------------------------------------------------------------------
# SoccerRNN forward (mirrors the PyTorch module)
# -----------------------------------------------------------------------------
def soccer_rnn_forward(kparams, x, hidden, *, seq_len, input_size, hidden_size):
    h0, c0 = hidden                       # each (n_layers=1, B, H)
    batch_size = x.shape[0]

    # input.view(seq_len, batch_size, -1)
    x_tmajor = jnp.reshape(x, (seq_len, batch_size, input_size))

    # Decoder requires seq_len * hidden == hidden, same constraint as PyTorch.
    assert seq_len * hidden_size == hidden_size, (
        "decoder reshape is only shape-valid when seq_len == 1 "
        "(same as the PyTorch reference)")

    out, h_n, c_n = soccer_rnn_pallas(x_tmajor, h0[0], c0[0], kparams)
    return out, (h_n[None, :, :], c_n[None, :, :])


# -----------------------------------------------------------------------------
# Pure-JAX f32 reference for validation
# -----------------------------------------------------------------------------
def reference_forward(raw, x, hidden, *, seq_len, input_size, hidden_size):
    h0, c0 = hidden
    B = x.shape[0]
    H = hidden_size
    xs = jnp.reshape(x, (seq_len, B, input_size))
    h, c = h0[0], c0[0]
    w_ih_t, w_hh_t = raw["w_ih"].T, raw["w_hh"].T
    b = (raw["b_ih"] + raw["b_hh"])[None, :]
    ys = []
    for t in range(seq_len):
        gates = xs[t] @ w_ih_t + h @ w_hh_t + b
        i = jax.nn.sigmoid(gates[:, 0:H])
        f = jax.nn.sigmoid(gates[:, H:2 * H])
        g = jnp.tanh(gates[:, 2 * H:3 * H])
        o = jax.nn.sigmoid(gates[:, 3 * H:4 * H])
        c = f * c + i * g
        h = o * jnp.tanh(c)
        ys.append(h)
    y = jnp.stack(ys, axis=0)
    out = jnp.reshape(y, (B, -1)) @ raw["w_dec"].T + raw["b_dec"][None, :]
    return out, (h[None], c[None])


if __name__ == "__main__":
    # seq_len must be 1 for the reference forward's decoder reshape to be valid.
    seq_len, input_size, hidden_size, n_layers = 1, 16, 32, 1
    batch = 8

    key = jax.random.PRNGKey(0)
    k_param, k_x = jax.random.split(key)
    raw = init_raw_params(k_param, input_size, hidden_size)
    kparams = prepare_kernel_params(raw, input_size, hidden_size)

    x = jax.random.normal(k_x, (batch, seq_len * input_size), jnp.float32)
    hidden = (jnp.zeros((n_layers, batch, hidden_size), jnp.float32),
              jnp.zeros((n_layers, batch, hidden_size), jnp.float32))

    out, (h_n, c_n) = soccer_rnn_forward(
        kparams, x, hidden,
        seq_len=seq_len, input_size=input_size, hidden_size=hidden_size)
    jax.block_until_ready((out, h_n, c_n))

    out_ref, (h_ref, c_ref) = reference_forward(
        raw, x, hidden,
        seq_len=seq_len, input_size=input_size, hidden_size=hidden_size)

    assert out.shape == (batch, input_size)
    assert h_n.shape == (n_layers, batch, hidden_size)
    assert c_n.shape == (n_layers, batch, hidden_size)
    assert jnp.allclose(out, out_ref, atol=2e-2, rtol=2e-2)
    assert jnp.allclose(h_n, h_ref, atol=2e-2, rtol=2e-2)
    assert jnp.allclose(c_n, c_ref, atol=2e-2, rtol=2e-2)

    print("KERNEL_OK")
</pallas_src>

<mosaic_0001>
module attributes {stable_mosaic.version = 11 : i64} {
  func.func @_soccer_rnn_kernel(%arg0: i32, %arg1: memref<1x8x16xbf16, #tpu.memory_space<vmem>>, %arg2: memref<8x32xf32, #tpu.memory_space<vmem>>, %arg3: memref<8x32xf32, #tpu.memory_space<vmem>>, %arg4: memref<16x128xbf16, #tpu.memory_space<vmem>>, %arg5: memref<32x128xf32, #tpu.memory_space<vmem>>, %arg6: memref<1x128xf32, #tpu.memory_space<vmem>>, %arg7: memref<32x16xf32, #tpu.memory_space<vmem>>, %arg8: memref<1x16xf32, #tpu.memory_space<vmem>>, %arg9: memref<8x16xf32, #tpu.memory_space<vmem>>, %arg10: memref<8x32xf32, #tpu.memory_space<vmem>>, %arg11: memref<8x32xf32, #tpu.memory_space<vmem>>, %arg12: memref<8x128xf32, #tpu.memory_space<vmem>>) attributes {dimension_semantics = [#tpu.dimension_semantics<arbitrary>], iteration_bounds = array<i64: 1>, scalar_prefetch = 0 : i64, scratch_operands = 1 : i64, tpu.core_type = #tpu.core_type<tc>, window_params = [{transform_indices = @transform_0, window_bounds = array<i64: 1, 8, 16>}, {pipeline_mode = #tpu.pipeline_mode<synchronous>, transform_indices = @transform_1, window_bounds = array<i64: 8, 32>}, {pipeline_mode = #tpu.pipeline_mode<synchronous>, transform_indices = @transform_2, window_bounds = array<i64: 8, 32>}, {pipeline_mode = #tpu.pipeline_mode<synchronous>, transform_indices = @transform_3, window_bounds = array<i64: 16, 128>}, {pipeline_mode = #tpu.pipeline_mode<synchronous>, transform_indices = @transform_4, window_bounds = array<i64: 32, 128>}, {pipeline_mode = #tpu.pipeline_mode<synchronous>, transform_indices = @transform_5, window_bounds = array<i64: 1, 128>}, {pipeline_mode = #tpu.pipeline_mode<synchronous>, transform_indices = @transform_6, window_bounds = array<i64: 32, 16>}, {pipeline_mode = #tpu.pipeline_mode<synchronous>, transform_indices = @transform_7, window_bounds = array<i64: 1, 16>}, {pipeline_mode = #tpu.pipeline_mode<synchronous>, transform_indices = @transform_8, window_bounds = array<i64: 8, 16>}, {pipeline_mode = #tpu.pipeline_mode<synchronous>, transform_indices = @transform_9, window_bounds = array<i64: 8, 32>}, {pipeline_mode = #tpu.pipeline_mode<synchronous>, transform_indices = @transform_10, window_bounds = array<i64: 8, 32>}]} {
    %c0_i32 = arith.constant 0 : i32
    %0 = arith.cmpi eq, %arg0, %c0_i32 : i32
    %1 = arith.extui %0 : i1 to i32
    %c0_i32_0 = arith.constant 0 : i32
    %2 = arith.cmpi ne, %1, %c0_i32_0 : i32
    scf.if %2 {
      %c0_27 = arith.constant 0 : index
      %c0_28 = arith.constant 0 : index
      %49 = vector.load %arg2[%c0_27, %c0_28] : memref<8x32xf32, #tpu.memory_space<vmem>>, vector<8x32xf32>
      %c0_29 = arith.constant 0 : index
      %c0_30 = arith.constant 0 : index
      %50 = vector.load %arg10[%c0_29, %c0_30] : memref<8x32xf32, #tpu.memory_space<vmem>>, vector<8x32xf32>
      tpu.vector_store %arg10[%c0_29, %c0_30], %49 {strides = array<i32>} : memref<8x32xf32, #tpu.memory_space<vmem>>, vector<8x32xf32>,
      %c0_31 = arith.constant 0 : index
      %c0_32 = arith.constant 0 : index
      %51 = vector.load %arg3[%c0_31, %c0_32] : memref<8x32xf32, #tpu.memory_space<vmem>>, vector<8x32xf32>
      %c0_33 = arith.constant 0 : index
      %c0_34 = arith.constant 0 : index
      %52 = vector.load %arg11[%c0_33, %c0_34] : memref<8x32xf32, #tpu.memory_space<vmem>>, vector<8x32xf32>
      tpu.vector_store %arg11[%c0_33, %c0_34], %51 {strides = array<i32>} : memref<8x32xf32, #tpu.memory_space<vmem>>, vector<8x32xf32>,
      %cst_35 = arith.constant 0.000000e+00 : f32
      %53 = vector.broadcast %cst_35 : f32 to vector<8x16xf32>
      %c0_36 = arith.constant 0 : index
      %c0_37 = arith.constant 0 : index
      %54 = vector.load %arg9[%c0_36, %c0_37] : memref<8x16xf32, #tpu.memory_space<vmem>>, vector<8x16xf32>
      tpu.vector_store %arg9[%c0_36, %c0_37], %53 {strides = array<i32>} : memref<8x16xf32, #tpu.memory_space<vmem>>, vector<8x16xf32>,
    } else {
    }
    %c0 = arith.constant 0 : index
    %c0_1 = arith.constant 0 : index
    %c0_2 = arith.constant 0 : index
    %3 = vector.load %arg1[%c0, %c0_1, %c0_2] : memref<1x8x16xbf16, #tpu.memory_space<vmem>>, vector<1x8x16xbf16>
    %4 = vector.shape_cast %3 : vector<1x8x16xbf16> to vector<8x16xbf16>
    %c0_3 = arith.constant 0 : index
    %c0_4 = arith.constant 0 : index
    %5 = vector.load %arg4[%c0_3, %c0_4] : memref<16x128xbf16, #tpu.memory_space<vmem>>, vector<16x128xbf16>
    %cst = arith.constant dense<0.000000e+00> : vector<8x128xf32>
    %6 = tpu.matmul %4, %5, %cst {dimension_numbers = #tpu.dot_dimension_numbers<[1], [0], [0], [1], [0, 0, 1, 1], [], []>} : vector<8x16xbf16>, vector<16x128xbf16>, vector<8x128xf32> -> vector<8x128xf32>
    %c0_5 = arith.constant 0 : index
    %c0_6 = arith.constant 0 : index
    %7 = vector.load %arg6[%c0_5, %c0_6] : memref<1x128xf32, #tpu.memory_space<vmem>>, vector<1x128xf32>
    %8 = vector.broadcast %7 : vector<1x128xf32> to vector<8x128xf32>
    %9 = arith.addf %6, %8 : vector<8x128xf32>
    %c0_7 = arith.constant 0 : index
    %c0_8 = arith.constant 0 : index
    %10 = vector.load %arg12[%c0_7, %c0_8] : memref<8x128xf32, #tpu.memory_space<vmem>>, vector<8x128xf32>
    tpu.vector_store %arg12[%c0_7, %c0_8], %9 {strides = array<i32>} : memref<8x128xf32, #tpu.memory_space<vmem>>, vector<8x128xf32>,
    %c0_9 = arith.constant 0 : index
    %c0_10 = arith.constant 0 : index
    %11 = vector.load %arg5[%c0_9, %c0_10] : memref<32x128xf32, #tpu.memory_space<vmem>>, vector<32x128xf32>
    %c0_11 = arith.constant 0 : index
    %c0_12 = arith.constant 0 : index
    %12 = vector.load %arg10[%c0_11, %c0_12] : memref<8x32xf32, #tpu.memory_space<vmem>>, vector<8x32xf32>
    %c0_13 = arith.constant 0 : index
    %c0_14 = arith.constant 0 : index
    %13 = vector.load %arg11[%c0_13, %c0_14] : memref<8x32xf32, #tpu.memory_space<vmem>>, vector<8x32xf32>
    %c0_i32_15 = arith.constant 0 : i32
    %c8_i32 = arith.constant 8 : i32
    %14 = arith.muli %c0_i32_15, %c8_i32 : i32
    %15 = arith.index_cast %14 : i32 to index
    %c0_16 = arith.constant 0 : index
    %16 = vector.load %arg12[%15, %c0_16] : memref<8x128xf32, #tpu.memory_space<vmem>>, vector<8x128xf32>
    %cst_17 = arith.constant dense<0.000000e+00> : vector<8x128xf32>
    %17 = tpu.matmul %12, %11, %cst_17 {dimension_numbers = #tpu.dot_dimension_numbers<[1], [0], [0], [1], [0, 0, 1, 1], [], []>} : vector<8x32xf32>, vector<32x128xf32>, vector<8x128xf32> -> vector<8x128xf32>
    %18 = arith.addf %16, %17 : vector<8x128xf32>
    %19 = vector.extract_strided_slice %18 {offsets = [0, 0], sizes = [8, 32], strides = [1, 1]} : vector<8x128xf32> to vector<8x32xf32>
    %20 = arith.negf %19 : vector<8x32xf32>
    %21 = math.exp %20 : vector<8x32xf32>
    %cst_18 = arith.constant 1.000000e+00 : f32
    %22 = vector.broadcast %cst_18 : f32 to vector<8x32xf32>
    %23 = arith.addf %22, %21 : vector<8x32xf32>
    %24 = arith.divf %22, %23 : vector<8x32xf32>
    %25 = vector.extract_strided_slice %18 {offsets = [0, 32], sizes = [8, 32], strides = [1, 1]} : vector<8x128xf32> to vector<8x32xf32>
    %26 = arith.negf %25 : vector<8x32xf32>
    %27 = math.exp %26 : vector<8x32xf32>
    %cst_19 = arith.constant 1.000000e+00 : f32
    %28 = vector.broadcast %cst_19 : f32 to vector<8x32xf32>
    %29 = arith.addf %28, %27 : vector<8x32xf32>
    %30 = arith.divf %28, %29 : vector<8x32xf32>
    %31 = vector.extract_strided_slice %18 {offsets = [0, 64], sizes = [8, 32], strides = [1, 1]} : vector<8x128xf32> to vector<8x32xf32>
    %32 = math.tanh %31 : vector<8x32xf32>
    %33 = vector.extract_strided_slice %18 {offsets = [0, 96], sizes = [8, 32], strides = [1, 1]} : vector<8x128xf32> to vector<8x32xf32>
    %34 = arith.negf %33 : vector<8x32xf32>
    %35 = math.exp %34 : vector<8x32xf32>
    %cst_20 = arith.constant 1.000000e+00 : f32
    %36 = vector.broadcast %cst_20 : f32 to vector<8x32xf32>
    %37 = arith.addf %36, %35 : vector<8x32xf32>
    %38 = arith.divf %36, %37 : vector<8x32xf32>
    %39 = arith.mulf %30, %13 : vector<8x32xf32>
    %40 = arith.mulf %24, %32 : vector<8x32xf32>
    %41 = arith.addf %39, %40 : vector<8x32xf32>
    %42 = math.tanh %41 : vector<8x32xf32>
    %43 = arith.mulf %38, %42 : vector<8x32xf32>
    %c1_i32 = arith.constant 1 : i32
    %c0_21 = arith.constant 0 : index
    %c0_22 = arith.constant 0 : index
    %44 = vector.load %arg10[%c0_21, %c0_22] : memref<8x32xf32, #tpu.memory_space<vmem>>, vector<8x32xf32>
    tpu.vector_store %arg10[%c0_21, %c0_22], %43 {strides = array<i32>} : memref<8x32xf32, #tpu.memory_space<vmem>>, vector<8x32xf32>,
    %c0_23 = arith.constant 0 : index
    %c0_24 = arith.constant 0 : index
    %45 = vector.load %arg11[%c0_23, %c0_24] : memref<8x32xf32, #tpu.memory_space<vmem>>, vector<8x32xf32>
    tpu.vector_store %arg11[%c0_23, %c0_24], %41 {strides = array<i32>} : memref<8x32xf32, #tpu.memory_space<vmem>>, vector<8x32xf32>,
    %c0_i32_25 = arith.constant 0 : i32
    %46 = arith.cmpi eq, %arg0, %c0_i32_25 : i32
    %47 = arith.extui %46 : i1 to i32
    %c0_i32_26 = arith.constant 0 : i32
    %48 = arith.cmpi ne, %47, %c0_i32_26 : i32
    scf.if %48 {
      %c0_27 = arith.constant 0 : index
      %c0_28 = arith.constant 0 : index
      %49 = vector.load %arg7[%c0_27, %c0_28] : memref<32x16xf32, #tpu.memory_space<vmem>>, vector<32x16xf32>
      %cst_29 = arith.constant dense<0.000000e+00> : vector<8x16xf32>
      %50 = tpu.matmul %43, %49, %cst_29 {dimension_numbers = #tpu.dot_dimension_numbers<[1], [0], [0], [1], [0, 0, 1, 1], [], []>} : vector<8x32xf32>, vector<32x16xf32>, vector<8x16xf32> -> vector<8x16xf32>
      %c0_30 = arith.constant 0 : index
      %c0_31 = arith.constant 0 : index
      %51 = vector.load %arg8[%c0_30, %c0_31] : memref<1x16xf32, #tpu.memory_space<vmem>>, vector<1x16xf32>
      %52 = vector.broadcast %51 : vector<1x16xf32> to vector<8x16xf32>
      %53 = arith.addf %50, %52 : vector<8x16xf32>
      %c0_32 = arith.constant 0 : index
      %c0_33 = arith.constant 0 : index
      %54 = vector.load %arg9[%c0_32, %c0_33] : memref<8x16xf32, #tpu.memory_space<vmem>>, vector<8x16xf32>
      tpu.vector_store %arg9[%c0_32, %c0_33], %53 {strides = array<i32>} : memref<8x16xf32, #tpu.memory_space<vmem>>, vector<8x16xf32>,
    } else {
    }
    return
  }
  func.func @transform_0(%arg0: i32) -> (i32, i32, i32) {
    %c0_i32 = arith.constant 0 : i32
    %c0_i32_0 = arith.constant 0 : i32
    %c0_i32_1 = arith.constant 0 : i32
    return %arg0, %c0_i32, %c0_i32_0 : i32, i32, i32
  }
  func.func @transform_1(%arg0: i32) -> (i32, i32) {
    %c0_i32 = arith.constant 0 : i32
    %c0_i32_0 = arith.constant 0 : i32
    %c0_i32_1 = arith.constant 0 : i32
    return %c0_i32, %c0_i32_0 : i32, i32
  }
  func.func @transform_2(%arg0: i32) -> (i32, i32) {
    %c0_i32 = arith.constant 0 : i32
    %c0_i32_0 = arith.constant 0 : i32
    %c0_i32_1 = arith.constant 0 : i32
    return %c0_i32, %c0_i32_0 : i32, i32
  }
  func.func @transform_3(%arg0: i32) -> (i32, i32) {
    %c0_i32 = arith.constant 0 : i32
    %c0_i32_0 = arith.constant 0 : i32
    %c0_i32_1 = arith.constant 0 : i32
    return %c0_i32, %c0_i32_0 : i32, i32
  }
  func.func @transform_4(%arg0: i32) -> (i32, i32) {
    %c0_i32 = arith.constant 0 : i32
    %c0_i32_0 = arith.constant 0 : i32
    %c0_i32_1 = arith.constant 0 : i32
    return %c0_i32, %c0_i32_0 : i32, i32
  }
  func.func @transform_5(%arg0: i32) -> (i32, i32) {
    %c0_i32 = arith.constant 0 : i32
    %c0_i32_0 = arith.constant 0 : i32
    %c0_i32_1 = arith.constant 0 : i32
    return %c0_i32, %c0_i32_0 : i32, i32
  }
  func.func @transform_6(%arg0: i32) -> (i32, i32) {
    %c0_i32 = arith.constant 0 : i32
    %c0_i32_0 = arith.constant 0 : i32
    %c0_i32_1 = arith.constant 0 : i32
    return %c0_i32, %c0_i32_0 : i32, i32
  }
  func.func @transform_7(%arg0: i32) -> (i32, i32) {
    %c0_i32 = arith.constant 0 : i32
    %c0_i32_0 = arith.constant 0 : i32
    %c0_i32_1 = arith.constant 0 : i32
    return %c0_i32, %c0_i32_0 : i32, i32
  }
  func.func @transform_8(%arg0: i32) -> (i32, i32) {
    %c0_i32 = arith.constant 0 : i32
    %c0_i32_0 = arith.constant 0 : i32
    %c0_i32_1 = arith.constant 0 : i32
    return %c0_i32, %c0_i32_0 : i32, i32
  }
  func.func @transform_9(%arg0: i32) -> (i32, i32) {
    %c0_i32 = arith.constant 0 : i32
    %c0_i32_0 = arith.constant 0 : i32
    %c0_i32_1 = arith.constant 0 : i32
    return %c0_i32, %c0_i32_0 : i32, i32
  }
  func.func @transform_10(%arg0: i32) -> (i32, i32) {
    %c0_i32 = arith.constant 0 : i32
    %c0_i32_0 = arith.constant 0 : i32
    %c0_i32_1 = arith.constant 0 : i32
    return %c0_i32, %c0_i32_0 : i32, i32
  }
}

</mosaic_0001>

<bundles_post_ra>
// kernel: tpu_custom_call.1
= control target key start
LH: loop header
LB: loop body
LE: loop exit
PB: predicated region body
PF: predicated region fallthrough
CT: control target
= control target key end

     0   :  { %16 = vsyncpa [#allocation4], 0  ;;  %s562_s0 = inlined_call_operand.hbm [shape: bf16[1,8,16], index: 0, kind: input, shape index: {}]   ;;  %s563_s1 = inlined_call_operand.vmem [shape: f32[8,32], index: 1, kind: input, shape index: {}]   ;;  %s564_s2 = inlined_call_operand.vmem [shape: f32[8,32], index: 2, kind: input, shape index: {}]   ;;  %s565_s3 = inlined_call_operand.hbm [shape: bf16[16,128], index: 3, kind: input, shape index: {}]   ;;  %s566_s4 = inlined_call_operand.vmem [shape: f32[32,128], index: 4, kind: input, shape index: {}]   ;;  %s567_s5 = inlined_call_operand.vmem [shape: f32[1,128], index: 5, kind: input, shape index: {}]   ;;  %s568_s6 = inlined_call_operand.vmem [shape: f32[32,16], index: 6, kind: input, shape index: {}]   ;;  %s569_s7 = inlined_call_operand.vmem [shape: f32[1,16], index: 7, kind: input, shape index: {}]   ;;  %s570_s8 = inlined_call_operand.hbm [shape: f32[8,16], index: 8, kind: output, shape index: {0}]   ;;  %s571_s9 = inlined_call_operand.hbm [shape: f32[8,32], index: 9, kind: output, shape index: {1}]   ;;  %s572_s10 = inlined_call_operand.hbm [shape: f32[8,32], index: 10, kind: output, shape index: {2}]  }
   0x1   :  { %17 = vsyncpa [#allocation7], 0 }
   0x2   :  { %18 = vsyncpa [#allocation5], 0 }
   0x3   :  { %19 = vsyncpa [#allocation10], 0  ;;  %s25_s15 = sshll.u32 %s562_s0, 4  ;;  %s430_s16 = smov [#allocation3]   ;;  %s26_s15 = int_to_ptr.hbm [resolvable:$true] %s25_s15 }
   0x4   :  { %s27_s17 = sshll.u32 %s430_s16, 4  ;;  %s39_s20 = sshll.u32 %s565_s3, 4  ;;  %s28_s17 = int_to_ptr.vmem [resolvable:$true] %s27_s17  ;;  %s40_s20 = int_to_ptr.hbm [resolvable:$true] %s39_s20 }
   0x5   :  { %30 = dma.hbm_to_vmem [thread:$0]  %s26_s15, 64, %s28_s17, [#allocation4]  }
   0x6   :  { %s431_s21 = smov [#allocation6]   ;;  %s432_s23 = smov 64  }
   0x7   :  { %s41_s22 = sshll.u32 %s431_s21, 4  ;;  %s433_s24 = smov 4   ;;  %s42_s22 = int_to_ptr.vmem [resolvable:$true] %s41_s22 }
   0x8   :  { %47 = dma.hbm_to_vmem [thread:$0]  %s40_s20, 128, %s42_s22, [#allocation7], %s432_s23, %s432_s23, %s433_s24  }
   0x9   :  { %422 = dma.done.wait [#allocation4], 64  }
   0xa   :  { %423 = vsyncadd [#allocation4], 4294967232 }
   0xb   :  { %424 = dma.done.wait [#allocation7], 128  }
   0xc   :  { %425 = vsyncadd [#allocation7], 4294967168  ;;  %vm74_vm0 = vcmask 130048   ;;  %v434_v0 = vmov 0.0   ;;  %v110_v1 = vld [vmem:[%s566_s4 + $0x18] sm:$0xff]  ;;  %v281_v2 = vld [vmem:[#allocation6] sm:$0xff] }
   0xd   :  { %75 = vst.msk [vmem:[#allocation8] sm:$0xff] %vm74_vm0, %v434_v0  ;;  %v109_v3 = vld [vmem:[%s566_s4 + $0x10] sm:$0xff]  ;;  %vm70_vm1 = vcmask 261120   ;;  %130 = vmatpush.msra.mxu1 %v110_v1  ;;  %v76_v4 = vld [vmem:[#allocation3] sm:$0xf]  ;;  %v108_v5 = vld [vmem:[%s566_s4 + $0x8] sm:$0xff]  ;;  %100 = vmatpush.bf16.msra.mxu0 %v281_v2 }
   0xe   :  { %v69_v6 = vld [vmem:[%s563_s1] sm:$0xff]  ;;  %v196_v38 = vld [vmem:[%s568_s6 + $0x18] sm:$0xff]  ;;  %v195_v39 = vld [vmem:[%s568_s6 + $0x10] sm:$0xff]  ;;  %s436_s22 = smov 96   ;;  %s242_s25 = sshll.u32 %s571_s9, 4  ;;  %s243_s25 = int_to_ptr.hbm [resolvable:$true] %s242_s25 }
   0xf   :  { %v72_v7 = vld [vmem:[%s564_s2] sm:$0xff]  ;;  %131 = vmatpush.msra.mxu1 %v109_v3  ;;  %71 = vst.msk [vmem:[#allocation9] sm:$0xff] %vm70_vm1, %v69_v6  ;;  %s435_s2 = smov 32   ;;  %215 = vmatpush.msra.mxu2 %v196_v38  ;;  %v194_v40 = vld [vmem:[%s568_s6 + $0x8] sm:$0xff]  ;;  %s253_s29 = sshll.u32 %s572_s10, 4  ;;  %s254_s29 = int_to_ptr.hbm [resolvable:$true] %s253_s29 }
  0x10   :  { %v107_v8 = vld [vmem:[%s566_s4] sm:$0xff]  ;;  %73 = vst.msk [vmem:[#allocation11] sm:$0xff] %vm70_vm1, %v72_v7  ;;  %277 = vmatmul.msk.bf16.vlgmr.msra.gmra.mxu0 %vm74_vm0, %v76_v4  ;;  %s439_s9 = smov [#allocation8]   ;;  %s231_s1 = sshll.u32 %s570_s8, 4  ;;  %s232_s1 = int_to_ptr.hbm [resolvable:$true] %s231_s1 }
  0x11   :  { %132 = vmatpush.msra.mxu1 %v108_v5  ;;  %v292_v10 = vld [vmem:[%s567_s5] ss:$0 sm:$0xff]  ;;  %216 = vmatpush.msra.mxu2 %v195_v39  ;;  %s229_s12 = sshll.u32 %s439_s9, 4  ;;  %s230_s12 = int_to_ptr.vmem [resolvable:$true] %s229_s12 }
  0x12   :  { %v193_v41 = vld [vmem:[%s568_s6] sm:$0xff]  ;;  %s438_s6 = smov [#allocation11]  }
  0x13   :  { %133 = vmatpush.msra.mxu1 %v107_v8  ;;  %217 = vmatpush.msra.mxu2 %v194_v40  ;;  %s251_s26 = sshll.u32 %s438_s6, 4  ;;  %v293_v46 = vld [vmem:[%s569_s7] ss:$0 sm:$0xff]  ;;  %s252_s26 = int_to_ptr.vmem [resolvable:$true] %s251_s26 }
  0x15   :  { %218 = vmatpush.msra.mxu2 %v193_v41 }
  0x16   :  { %v111_v9 = vld [vmem:[#allocation9] sm:$0xff] }
  0x17   :  { %278 = vmatmul.msk.f32.vlgmr.msra.gmra.mxu1 %vm70_vm1, %v111_v9  ;;  %v112_v17 = vld [vmem:[#allocation11] sm:$0xff] }
  0x8d   :  { %v102_v11 = vpop.f32.mrf.mxu0 }
  0x8e   :  { %v103_v12 = vadd.f32 %v292_v10, %v102_v11 }
  0x94   :  { %v135_v13 = vpop.f32.mrf.mxu1 }
  0x95   :  { %v138_v14 = vadd.f32 %v135_v13, %v103_v12  ;;  %v104_v15 = vpop.f32.mrf.mxu0 }
  0x97   :  { %294 = vtanh.f32 %v138_v14  ;;  %v279_v18 = vmul.f32 -1.442695, %v138_v14 }
  0x99   :  { %296 = vpow2.f32 %v279_v18 }
  0x9d   :  { %v295_v16 = vpop.eup %294 }
  0x9e   :  { %165 = vrot.lane.b32.xlu0 %v295_v16, %s432_s23 }
  0x9f   :  { %v297_v19 = vpop.eup %296 }
  0xa0   :  { %v142_v20 = vadd.f32 1.0, %v297_v19 }
  0xa2   :  { %298 = vrcp.f32 %v142_v20  ;;  %v154_v26 = vand.u32 2147483648, %v142_v20  ;;  %vm148_vm3 = vweird.f32 %v142_v20  ;;  %v152_v27 = vand.u32 2147483647, %v142_v20 }
  0xa4   :  { %v155_v29 = vor.u32 1.1754944e-38, %v154_v26  ;;  %vm153_vm5 = vcmp.eq.f32.partialorder %v152_v27, 8.507059e+37 }
  0xa6   :  { %160 = vrot.lane.b32.xlu0 %v112_v17, %s435_s2 }
  0xa8   :  { %v299_v21 = vpop.eup %298 }
  0xa9   :  { %v144_v22 = vmul.f32 %v299_v21, %v142_v20  ;;  %vm149_vm2 = vweird.f32 %v299_v21 }
  0xaa   :  { %vm150_vm4 = vmor %vm148_vm3, %vm149_vm2 }
  0xab   :  { %v145_v23 = vsub.f32 1.0, %v144_v22 }
  0xad   :  { %v146_v24 = vmul.f32 %v299_v21, %v145_v23 }
  0xaf   :  { %v147_v25 = vadd.f32 %v299_v21, %v146_v24 }
  0xb1   :  { %v151_v28 = vsel %vm150_vm4, %v299_v21, %v147_v25 }
  0xb2   :  { %v156_v31 = vsel %vm153_vm5, %v155_v29, %v151_v28 }
 0x110   :  { %v166_v30 = vpop.permute.xlu0 %165 }
 0x111   :  { %v168_v32 = vmul.f32 %v166_v30, %v156_v31 }
 0x113   :  { %170 = vrot.lane.b32.xlu1 %v168_v32, %s435_s2 }
 0x118   :  { %v161_v33 = vpop.permute.xlu0 %160 }
 0x119   :  { %v163_v34 = vmul.f32 %v161_v33, %v156_v31 }
 0x185   :  { %v171_v35 = vpop.permute.xlu1 %170 }
 0x186   :  { %v173_v36 = vadd.f32 %v171_v35, %v163_v34 }
 0x188   :  { %300 = vtanh.f32 %v173_v36 }
 0x18e   :  { %v301_v37 = vpop.eup %300 }
 0x18f   :  { %176 = vrot.lane.b32.xlu1 %v301_v37, %s432_s23  ;;  %s437_s23 = smov [#allocation9]  }
 0x190   :  { %s240_s24 = sshll.u32 %s437_s23, 4  ;;  %s241_s24 = int_to_ptr.vmem [resolvable:$true] %s240_s24 }
 0x201   :  { %v177_v42 = vpop.permute.xlu1 %176 }
 0x202   :  { %v179_v43 = vmul.f32 %v177_v42, %v156_v31 }
 0x204   :  { %181 = vrot.lane.b32.xlu2 %v179_v43, %s435_s2 }
 0x20c   :  { %186 = vrot.lane.b32.xlu2 %v173_v36, %s436_s22 }
 0x25e   :  { %v182_v44 = vpop.permute.xlu2 %181 }
 0x25f   :  { %184 = vst.msk [vmem:[#allocation9] sm:$0xff] %vm70_vm1, %v182_v44  ;;  %280 = vmatmul.msk.f32.vlgmr.msra.gmra.mxu2 %vm70_vm1, %v182_v44 }
 0x260   :  { %245 = dma.vmem_to_hbm [thread:$0]  %s241_s24, 128, %s243_s25, [#allocation10]  }
 0x266   :  { %v187_v45 = vpop.permute.xlu2 %186 }
 0x267   :  { %189 = vst.msk [vmem:[#allocation11] sm:$0xff] %vm70_vm1, %v187_v45 }
 0x268   :  { %256 = dma.vmem_to_hbm [thread:$0]  %s252_s26, 128, %s254_s29, [#allocation10]  }
 0x2e2   :  { %v220_v47 = vpop.f32.mrf.mxu2 }
 0x2e3   :  { %v221_v48 = vadd.f32 %v293_v46, %v220_v47 }
 0x2e5   :  { %223 = vst.msk [vmem:[#allocation8] sm:$0xff] %vm74_vm0, %v221_v48 }
 0x2e6   :  { %234 = dma.vmem_to_hbm [thread:$0]  %s230_s12, 128, %s232_s1, [#allocation5]  }
 0x2e7   :  { %426 = dma.done.wait [#allocation5], 128  }
 0x2e8   :  { %427 = vsyncadd [#allocation5], 4294967168 }
 0x2e9   :  { %428 = dma.done.wait [#allocation10], 256  }
 0x2ea   :  { %429 = vsyncadd [#allocation10], 4294967040 }
 0x2eb   :  { %269 = vsyncpa [#allocation4], 1 }
 0x2ec   :  { %270 = vsyncpa [#allocation7], 1 }
 0x2ed   :  { %271 = vsyncpa [#allocation5], 1 }
 0x2ee   :  { %272 = vsyncpa [#allocation10], 1 }

</bundles_post_ra>
